<compile_context>
chip_gen: v7x
topology: tpu7x:2x2x1
jax: 0.10.0
libtpu: 0.0.40
codegen_flags: <defaults>
</compile_context>

<pallas_src>
import functools

import numpy as np
import jax
import jax.numpy as jnp
from jax.experimental import pallas as pl
from jax.experimental.pallas import tpu as pltpu


def _eqlr_conv_kernel(x_ref, w_ref, b_ref, o_ref, *scratch_refs,
                      scale, kh, kw, stride, out_h, padding):
    """Conv over a block of NB batch elements.

    x_ref: (NB, H, W)        unpadded input block
    w_ref: (out_ch, KH*KW)   flattened weight
    b_ref: (out_ch, 1)       bias
    o_ref: (NB, out_ch, H_out)  output, already in PyTorch's (out_ch, H_out) order
    """
    nb = x_ref.shape[0]
    out_ch, k = w_ref.shape

    if padding > 0:
        xp_ref, = scratch_refs                       # (NB, H+2p, W+2p) VMEM scratch
        _, h, w = x_ref.shape
        # Zero + copy every grid step so iterations stay independent ("parallel" axis).
        xp_ref[...] = jnp.zeros(xp_ref.shape, xp_ref.dtype)
        xp_ref[:, padding:padding + h, padding:padding + w] = x_ref[...]
        src = xp_ref
    else:
        src = x_ref

    # KH taps read straight from the (scratch or input) Ref window, fused along K so
    # each batch element's conv is a single MXU matmul.
    taps = []
    for i in range(kh):                              # static trip count
        rows = pl.ds(i, out_h) if stride == 1 else pl.ds(i, out_h, stride)
        taps.append(src[:, rows, 0:kw])              # (NB, H_out, KW)
    xs = jnp.concatenate(taps, axis=-1)              # (NB, H_out, KH*KW)

    # Batched MXU matmul, directly in the PyTorch output orientation:
    # (NB, out_ch, K) x (NB, H_out, K) -> (NB, out_ch, H_out).  No transpose needed.
    w_b = jnp.broadcast_to(w_ref[...][None], (nb, out_ch, k))
    acc = jnp.einsum('bok,bhk->boh', w_b, xs, preferred_element_type=jnp.float32)

    # f32 epilogue: equalized-LR scale + bias.
    o_ref[...] = (acc * scale + b_ref[...][None]).astype(o_ref.dtype)


def equalized_lr_conv2d(x, weight, bias, *, stride=1, padding=0, batch_block=None):
    """x: (N, H, W); weight: (out_ch, 1, KH, KW); bias: (out_ch,) -> (N, out_ch, H_out)."""
    out_ch, in_ch, kh, kw = weight.shape
    assert in_ch == 1, "forward unsqueezes a C=1 dim, so weight in_ch must be 1"
    scale = float(np.sqrt(2.0 / (in_ch * kh * kw)))  # same formula as __init__

    n, h, w = x.shape
    hp, wp = h + 2 * padding, w + 2 * padding
    out_h = (hp - kh) // stride + 1
    out_w = (wp - kw) // stride + 1
    assert out_w == 1, "module's .squeeze(-1) targets the full-width (W_out == 1) case"

    # Batch block size: amortize grid-step overhead; stay well under the VMEM limit
    # (x is double-buffered, out is double-buffered, scratch is single).
    itemsize = jnp.dtype(x.dtype).itemsize
    per_elem = (2 * h * w + (hp * wp if padding > 0 else 0)
                + 2 * out_ch * out_h) * itemsize
    if batch_block is None:
        nb = max(1, min(n, 256, (4 << 20) // max(per_elem, 1)))
    else:
        nb = max(1, min(n, batch_block))
    while n % nb:                                     # snap to a divisor of N
        nb -= 1

    w_flat = weight.reshape(out_ch, kh * kw)          # row-major (i*KW + j) == tap order
    b2 = bias.reshape(out_ch, 1)

    kern = functools.partial(_eqlr_conv_kernel, scale=scale, kh=kh, kw=kw,
                             stride=stride, out_h=out_h, padding=padding)
    scratch = [pltpu.VMEM((nb, hp, wp), x.dtype)] if padding > 0 else []

    return pl.pallas_call(
        kern,
        out_shape=jax.ShapeDtypeStruct((n, out_ch, out_h), x.dtype),
        grid=(n // nb,),
        in_specs=[
            pl.BlockSpec((nb, h, w), lambda b: (b, 0, 0)),
            pl.BlockSpec((out_ch, kh * kw), lambda b: (0, 0)),
            pl.BlockSpec((out_ch, 1), lambda b: (0, 0)),
        ],
        out_specs=pl.BlockSpec((nb, out_ch, out_h), lambda b: (b, 0, 0)),
        scratch_shapes=scratch,
        compiler_params=pltpu.CompilerParams(dimension_semantics=("parallel",)),
    )(x, w_flat, b2)


def _reference(x, weight, bias, *, stride, padding):
    """Plain-JAX reference of the exact PyTorch semantics."""
    out_ch, in_ch, kh, kw = weight.shape
    scale = float(np.sqrt(2.0 / (in_ch * kh * kw)))
    x4 = x[:, None, :, :]                             # x.unsqueeze(1) -> NCHW
    ref = jax.lax.conv_general_dilated(
        x4, weight * scale, window_strides=(stride, stride),
        padding=[(padding, padding), (padding, padding)],
        dimension_numbers=("NCHW", "OIHW", "NCHW"))
    ref = ref + bias[None, :, None, None]
    return jnp.squeeze(ref, axis=-1)                  # .squeeze(-1)


if __name__ == "__main__":
    key = jax.random.PRNGKey(0)

    # Case 1: padding=0 (the canonical full-width config implied by forward).
    N, H, W = 2, 16, 8
    out_ch, in_ch = 4, 1
    KH, KW = 3, 8
    stride, padding = 1, 0

    kx, kw_, key = jax.random.split(key, 3)
    x = jax.random.normal(kx, (N, H, W), jnp.float32)
    weight = jax.random.normal(kw_, (out_ch, in_ch, KH, KW), jnp.float32)  # nn.init.normal_
    bias = jnp.zeros((out_ch,), jnp.float32)                               # nn.init.zeros_

    out = jax.block_until_ready(
        equalized_lr_conv2d(x, weight, bias, stride=stride, padding=padding))
    ref = _reference(x, weight, bias, stride=stride, padding=padding)
    assert out.shape == ref.shape == (N, out_ch, (H - KH) // stride + 1)
    np.testing.assert_allclose(np.asarray(out), np.asarray(ref), rtol=1e-5, atol=1e-5)

    # Case 2: padding=1 — exercises the in-kernel zero-fill (no wrapper jnp.pad).
    KH2, KW2, pad2 = 3, W + 2, 1
    kx2, kw2 = jax.random.split(key)
    x2 = jax.random.normal(kx2, (N, H, W), jnp.float32)
    weight2 = jax.random.normal(kw2, (out_ch, in_ch, KH2, KW2), jnp.float32)
    bias2 = jnp.zeros((out_ch,), jnp.float32)

    out2 = jax.block_until_ready(
        equalized_lr_conv2d(x2, weight2, bias2, stride=1, padding=pad2))
    ref2 = _reference(x2, weight2, bias2, stride=1, padding=pad2)
    assert out2.shape == ref2.shape == (N, out_ch, (H + 2 * pad2 - KH2) + 1)
    np.testing.assert_allclose(np.asarray(out2), np.asarray(ref2), rtol=1e-5, atol=1e-5)

    print("KERNEL_OK")
</pallas_src>

<mosaic_0001>
module attributes {stable_mosaic.version = 11 : i64} {
  func.func @_eqlr_conv_kernel(%arg0: i32, %arg1: memref<2x16x8xf32, #tpu.memory_space<vmem>>, %arg2: memref<4x24xf32, #tpu.memory_space<vmem>>, %arg3: memref<4x1xf32, #tpu.memory_space<vmem>>, %arg4: memref<2x4x14xf32, #tpu.memory_space<vmem>>) attributes {dimension_semantics = [#tpu.dimension_semantics<parallel>], iteration_bounds = array<i64: 1>, scalar_prefetch = 0 : i64, scratch_operands = 0 : i64, tpu.core_type = #tpu.core_type<tc>, window_params = [{transform_indices = @transform_0, window_bounds = array<i64: 2, 16, 8>}, {pipeline_mode = #tpu.pipeline_mode<synchronous>, transform_indices = @transform_1, window_bounds = array<i64: 4, 24>}, {pipeline_mode = #tpu.pipeline_mode<synchronous>, transform_indices = @transform_2, window_bounds = array<i64: 4, 1>}, {transform_indices = @transform_3, window_bounds = array<i64: 2, 4, 14>}]} {
    %c0 = arith.constant 0 : index
    %c0_0 = arith.constant 0 : index
    %c0_1 = arith.constant 0 : index
    %0 = vector.load %arg1[%c0, %c0_0, %c0_1] : memref<2x16x8xf32, #tpu.memory_space<vmem>>, vector<2x14x8xf32>
    %c0_2 = arith.constant 0 : index
    %c1 = arith.constant 1 : index
    %c0_3 = arith.constant 0 : index
    %1 = vector.load %arg1[%c0_2, %c1, %c0_3] : memref<2x16x8xf32, #tpu.memory_space<vmem>>, vector<2x14x8xf32>
    %c0_4 = arith.constant 0 : index
    %c2 = arith.constant 2 : index
    %c0_5 = arith.constant 0 : index
    %2 = vector.load %arg1[%c0_4, %c2, %c0_5] : memref<2x16x8xf32, #tpu.memory_space<vmem>>, vector<2x14x8xf32>
    %3 = tpu.concatenate %0, %1, %2 in 2 : vector<2x14x8xf32>, vector<2x14x8xf32>, vector<2x14x8xf32> -> vector<2x14x24xf32>
    %c0_6 = arith.constant 0 : index
    %c0_7 = arith.constant 0 : index
    %4 = vector.load %arg2[%c0_6, %c0_7] : memref<4x24xf32, #tpu.memory_space<vmem>>, vector<4x24xf32>
    %5 = vector.shape_cast %4 : vector<4x24xf32> to vector<1x4x24xf32>
    %6 = vector.shape_cast %5 : vector<1x4x24xf32> to vector<1x4x24xf32>
    %7 = vector.broadcast %6 : vector<1x4x24xf32> to vector<2x4x24xf32>
    "tpu.trace_start"() <{level = 10 : i32, message = "bok,bhk->boh"}> : () -> ()
    %cst = arith.constant dense<0.000000e+00> : vector<2x4x14xf32>
    %8 = tpu.matmul %7, %3, %cst {dimension_numbers = #tpu.dot_dimension_numbers<[2], [2], [1], [1], [0, 0, 0, 1, 1, 1], [0], [0]>} : vector<2x4x24xf32>, vector<2x14x24xf32>, vector<2x4x14xf32> -> vector<2x4x14xf32>
    "tpu.trace_stop"() : () -> ()
    %cst_8 = arith.constant 0.288675129 : f32
    %9 = vector.broadcast %cst_8 : f32 to vector<2x4x14xf32>
    %10 = arith.mulf %8, %9 : vector<2x4x14xf32>
    %c0_9 = arith.constant 0 : index
    %c0_10 = arith.constant 0 : index
    %11 = vector.load %arg3[%c0_9, %c0_10] : memref<4x1xf32, #tpu.memory_space<vmem>>, vector<4x1xf32>
    %12 = vector.shape_cast %11 : vector<4x1xf32> to vector<1x4x1xf32>
    %13 = vector.broadcast %12 : vector<1x4x1xf32> to vector<2x4x14xf32>
    %14 = arith.addf %10, %13 : vector<2x4x14xf32>
    %c0_11 = arith.constant 0 : index
    %c0_12 = arith.constant 0 : index
    %c0_13 = arith.constant 0 : index
    %15 = vector.load %arg4[%c0_11, %c0_12, %c0_13] : memref<2x4x14xf32, #tpu.memory_space<vmem>>, vector<2x4x14xf32>
    tpu.vector_store %arg4[%c0_11, %c0_12, %c0_13], %14 {strides = array<i32>} : memref<2x4x14xf32, #tpu.memory_space<vmem>>, vector<2x4x14xf32>,
    return
  }
  func.func @transform_0(%arg0: i32) -> (i32, i32, i32) {
    %c0_i32 = arith.constant 0 : i32
    %c0_i32_0 = arith.constant 0 : i32
    %c0_i32_1 = arith.constant 0 : i32
    return %arg0, %c0_i32, %c0_i32_0 : i32, i32, i32
  }
  func.func @transform_1(%arg0: i32) -> (i32, i32) {
    %c0_i32 = arith.constant 0 : i32
    %c0_i32_0 = arith.constant 0 : i32
    %c0_i32_1 = arith.constant 0 : i32
    return %c0_i32, %c0_i32_0 : i32, i32
  }
  func.func @transform_2(%arg0: i32) -> (i32, i32) {
    %c0_i32 = arith.constant 0 : i32
    %c0_i32_0 = arith.constant 0 : i32
    %c0_i32_1 = arith.constant 0 : i32
    return %c0_i32, %c0_i32_0 : i32, i32
  }
  func.func @transform_3(%arg0: i32) -> (i32, i32, i32) {
    %c0_i32 = arith.constant 0 : i32
    %c0_i32_0 = arith.constant 0 : i32
    %c0_i32_1 = arith.constant 0 : i32
    return %arg0, %c0_i32, %c0_i32_0 : i32, i32, i32
  }
}

</mosaic_0001>

<bundles_post_ra>
// kernel: tpu_custom_call.1
= control target key start
LH: loop header
LB: loop body
LE: loop exit
PB: predicated region body
PF: predicated region fallthrough
CT: control target
= control target key end

     0   :  { %s343_s28 = smov 8   ;;  %v344_v11 = vmov 0.0|0.0   ;;  %s345_s29 = smov 16   ;;  %vm346_vm0 = vmmov 0   ;;  %v347_v13 = vmov 0.0   ;;  %s438_s0 = inlined_call_operand.vmem [shape: f32[2,16,8], index: 0, kind: input, shape index: {}]   ;;  %s439_s1 = inlined_call_operand.vmem [shape: f32[4,24], index: 1, kind: input, shape index: {}]   ;;  %s440_s2 = inlined_call_operand.vmem [shape: f32[4,1], index: 2, kind: input, shape index: {}]   ;;  %s441_s3 = inlined_call_operand.hbm [shape: f32[2,4,14], index: 3, kind: output, shape index: {}]  }
   0x1   :  { %v19_v0 = vld [vmem:[%s438_s0 + $0x1] sm:$0xff]  ;;  %v20_v1 = vld [vmem:[%s438_s0 + $0x9] sm:$0x3f]  ;;  %v21_v5 = vld [vmem:[%s438_s0 + $0x11] sm:$0xff]  ;;  %281 = vmatprep.subr.bf16.mxu0 %v344_v11  ;;  %285 = vmatprep.subr.bf16.mxu1 %v344_v11 }
   0x2   :  { %v23_v2 = vld [vmem:[%s438_s0 + $0x2] sm:$0xff]  ;;  %v298_v3 = vpack.i.bf16 %v20_v1, %v19_v0  ;;  %v24_v4 = vld [vmem:[%s438_s0 + $0xa] sm:$0x3f]  ;;  %v22_v6 = vld [vmem:[%s438_s0 + $0x19] sm:$0x3f]  ;;  %271 = vmatprep.mubr.msk.f32.mxu0 %vm346_vm0, %v347_v13  ;;  %278 = vmatprep.mubr.msk.f32.mxu1 %vm346_vm0, %v347_v13 }
   0x3   :  { %v308_v7 = vpack.i.bf16 %v24_v4, %v23_v2  ;;  %v25_v8 = vld [vmem:[%s438_s0 + $0x12] sm:$0xff]  ;;  %v26_v9 = vld [vmem:[%s438_s0 + $0x1a] sm:$0x3f]  ;;  %v303_v10 = vpack.i.bf16 %v22_v6, %v21_v5 }
   0x4   :  { %299 = vrot.lane.b32.xlu0 %v298_v3, %s343_s28  ;;  %v313_v12 = vpack.i.bf16 %v26_v9, %v25_v8 }
   0x5   :  { %309 = vrot.lane.b32.xlu1 %v308_v7, %s345_s29 }
   0x6   :  { %8 = vsyncpa [#allocation3], 0  ;;  %v348_v14 = vmov 0   ;;  %v228_v15 = vld [vmem:[%s440_s2] sm:$0xf]  ;;  %vm59_vm1 = vcmask 64512  }
   0x7   :  { %318 = vset.pattern.permute.xlu0 %v348_v14  ;;  %v15_v17 = vld [vmem:[%s438_s0] sm:$0xff]  ;;  %v16_v18 = vld [vmem:[%s438_s0 + $0x8] sm:$0x3f]  ;;  %vm64_vm2 = vcmask 130048   ;;  %vm70_vm3 = vcmask 195584   ;;  %v17_v27 = vld [vmem:[%s438_s0 + $0x10] sm:$0xff] }
   0x8   :  { %304 = vrot.lane.b32.xlu0 %v303_v10, %s343_s28  ;;  %v18_v28 = vld [vmem:[%s438_s0 + $0x18] sm:$0x3f]  ;;  %vm283_vm4 = vmpackc.low %vm70_vm3, %vm70_vm3  ;;  %v69_v42 = vld [vmem:[%s439_s1] sm:$0xf]  ;;  %vm236_vm5 = vcmask 109568   ;;  %s349_s13 = smov [#allocation2]  }
   0x9   :  { %314 = vrot.lane.b32.xlu1 %v313_v12, %s345_s29  ;;  %s244_s14 = sshll.u32 %s349_s13, 4  ;;  %s245_s14 = int_to_ptr.vmem [resolvable:$true] %s244_s14 }
   0xa   :  { %s319_s1 = scalar_lea.vmem %s245_s14, 128  ;;  %p324_p1 = scmp.lt.s32.totalorder %s245_s14, %s245_s14 }
   0xb   :  { %p320_p0 = scmp.ne.s32.totalorder %s245_s14, %s319_s1  ;;  %p325_p2 = scmp.lt.s32.totalorder %s319_s1, %s319_s1 }
   0xc   :  { %231 = vperm.xlu0 %318, %v228_v15  }
   0xd   :  { %p326_p3 = por %p325_p2, %p324_p1 }
   0xf   :  { %p327_p4 = pnand %p326_p3, %p320_p0 }
  0x76   :  { %v300_v16 = vpop.permute.xlu0 %299 }
  0x77   :  { %v302_v19 = vunpack.i.h.bf16 %v300_v16  ;;  %v301_v20 = vunpack.i.l.bf16 %v300_v16  ;;  %v310_v21 = vpop.permute.xlu1 %309 }
  0x78   :  { %v312_v22 = vunpack.i.h.bf16 %v310_v21  ;;  %v311_v23 = vunpack.i.l.bf16 %v310_v21 }
  0x79   :  { %v60_v24 = vsel %vm59_vm1, %v15_v17, %v301_v20  ;;  %v61_v25 = vsel %vm59_vm1, %v16_v18, %v302_v19 }
  0x7a   :  { %v305_v26 = vpop.permute.xlu0 %304  ;;  %v65_v29 = vsel %vm64_vm2, %v60_v24, %v311_v23  ;;  %v66_v30 = vsel %vm64_vm2, %v61_v25, %v312_v22 }
  0x7b   :  { %v307_v31 = vunpack.i.h.bf16 %v305_v26  ;;  %v306_v32 = vunpack.i.l.bf16 %v305_v26  ;;  %v315_v33 = vpop.permute.xlu1 %314  ;;  %v282_v34 = vpack.c.bf16 %v66_v30, %v65_v29 }
  0x7c   :  { %v317_v35 = vunpack.i.h.bf16 %v315_v33  ;;  %v316_v36 = vunpack.i.l.bf16 %v315_v33 }
  0x7d   :  { %v62_v37 = vsel %vm59_vm1, %v17_v27, %v306_v32  ;;  %v63_v38 = vsel %vm59_vm1, %v18_v28, %v307_v31  ;;  %284 = vmatpush3.bf16.xpose.msk.msra.mxu0 %vm283_vm4, %v282_v34 }
  0x7e   :  { %v67_v39 = vsel %vm64_vm2, %v62_v37, %v316_v36  ;;  %v68_v40 = vsel %vm64_vm2, %v63_v38, %v317_v35 }
  0x7f   :  { %v286_v41 = vpack.c.bf16 %v68_v40, %v67_v39 }
  0x81   :  { %288 = vmatpush3.bf16.xpose.msk.msra.mxu1 %vm283_vm4, %v286_v41 }
  0x84   :  { %272 = vmatmul.mubr.msk.f32.vlgmr.msra.gmra.mrb[0].mxu0 %vm70_vm3, %v69_v42 }
  0x88   :  { %279 = vmatmul.mubr.msk.f32.vlgmr.msra.gmra.mrb[0].mxu1 %vm70_vm3, %v69_v42 }
  0x8b   :  { %v232_v44 = vpop.permute.xlu0 %231 }
 0x157   :  { %v146_v43 = vpop.f32.mrb[0].mxu0 }
 0x158   :  { %v226_v45 = vmul.f32 0.28867513, %v146_v43  ;;  %v273_v46 = vpop.f32.mrb[1].mxu0 }
 0x15a   :  { %v234_v47 = vadd.f32 %v232_v44, %v226_v45 }
 0x15b   :  { %v222_v48 = vpop.f32.mrb[0].mxu1 }
 0x15c   :  { %v227_v49 = vmul.f32 0.28867513, %v222_v48  ;;  %v280_v50 = vpop.f32.mrb[1].mxu1  ;;  %237 = vst.msk [vmem:[#allocation2] sm:$0xf] %vm236_vm5, %v234_v47 }
 0x15e   :  { %v235_v51 = vadd.f32 %v232_v44, %v227_v49 }
 0x160   :  { %238 = vst.msk [vmem:[#allocation2 + $0x4] sm:$0xf] %vm236_vm5, %v235_v51 }
 0x161   :  { %330 = shalt.err (!%p327_p4)
}
 0x162   :  { %s331_s17 = scalar_lea.hbm %s441_s3, 128 }
 0x163   :  { %p332_p5 = scmp.ne.s32.totalorder %s441_s3, %s331_s17  ;;  %p335_p6 = scmp.lt.u32.totalorder %s331_s17, %s441_s3 }
 0x165   :  { %p337_p7 = pnand %p335_p6, %p332_p5 }
 0x167   :  { %340 = shalt.err (!%p337_p7)
}
 0x168   :  { %s350_s22 = smov 64   ;;  %s351_s23 = smov 4  }
 0x169   :  { %250 = dma.vmem_to_hbm [thread:$0]  %s245_s14, 128, %s441_s3, [#allocation3], %s350_s22, %s350_s22, %s351_s23  }
 0x16a   :  { %341 = dma.done.wait [#allocation3], 128  }
 0x16b   :  { %342 = vsyncadd [#allocation3], 4294967168 }
 0x16c   :  { %254 = vsyncpa [#allocation3], 1 }

</bundles_post_ra>
